<compile_context>
chip_gen: v7x
topology: tpu7x:2x2x1
jax: 0.10.0
libtpu: 0.0.40
codegen_flags: <defaults>
</compile_context>

<pallas_src>
import functools

import jax
import jax.numpy as jnp
from jax.experimental import pallas as pl
from jax.experimental.pallas import tpu as pltpu


def _round_up(x, m):
    return (x + m - 1) // m * m


def _gat_kernel(adj_ref, h_ref, f1_ref, f2_ref, out_ref, acc_ref, *,
                alpha, concat, f_out):
    """One (row_tile, col_tile) step of adjacency-masked attention.

    adj_ref : (TM, TN)  int8   0/1 adjacency tile
    h_ref   : (TN, Fp)  f32    column block of [h | 1 | 0-pad]
    f1_ref  : (TM, 1)   f32    a1·h_i for the row tile
    f2_ref  : (1, TN)   f32    a2·h_j for the column tile
    out_ref : (TM, Fp)  f32    padded output row tile (written at finalize)
    acc_ref : (TM, Fp)  f32    VMEM accumulator for E @ [h | 1]
    """
    j = pl.program_id(1)

    @pl.when(j == 0)
    def _():
        acc_ref[...] = jnp.zeros_like(acc_ref)

    # attention logits for this tile: s_ij = a1·h_i + a2·h_j
    s = f1_ref[...] + f2_ref[...]                              # (TM, TN)
    lrelu = jnp.where(s > 0.0, s, alpha * s)
    # adjacency is a 0/1 mask -> multiply instead of compare+select
    e = adj_ref[...].astype(jnp.float32) * jnp.exp(-lrelu)     # (TM, TN)

    # Single MXU matmul accumulates both E @ h and the row sums
    # (the ones column of h_ref picks up sum_j e_ij).
    acc_ref[...] += jnp.dot(e, h_ref[...], preferred_element_type=jnp.float32)

    @pl.when(j == pl.num_programs(1) - 1)
    def _():
        acc = acc_ref[...]
        rowsum = acc[:, f_out:f_out + 1]                       # (TM, 1)
        # Guard padded rows / isolated nodes (acc is 0 there -> output 0, not NaN).
        rowsum = jnp.where(rowsum == 0.0, 1.0, rowsum)
        h_prime = acc * pl.reciprocal(rowsum, approx=False)
        if concat:
            # ELU (alpha = 1.0, the F.elu default); clamp the exp argument so the
            # unselected branch never produces inf.
            h_prime = jnp.where(h_prime > 0.0, h_prime,
                                jnp.exp(jnp.minimum(h_prime, 0.0)) - 1.0)
        out_ref[...] = h_prime.astype(out_ref.dtype)


def sp_graph_attention_layer(x, adj, W, a, *, alpha, concat=True,
                             block_m=256, block_n=512):
    """Forward pass of SpGraphAttentionLayer (eval mode, dropout = identity)."""
    N, _ = x.shape
    f_out = W.shape[1]
    assert a.shape == (1, 2 * f_out)

    # ---- hoisted dense precompute (plain XLA): h, f1, f2 -----------------------
    h = (x @ W).astype(jnp.float32)                            # (N, F_out)
    f1 = h @ a[:, :f_out].T                                    # (N, 1)
    f2 = (h @ a[:, f_out:].T).T                                # (1, N)

    # ---- padding so every block is lane/sublane friendly -----------------------
    f_pad = _round_up(f_out + 1, 128)        # +1 column of ones -> rowsum via MXU
    tm = min(block_m, _round_up(N, 128))
    tn = min(block_n, _round_up(N, 128))
    n_rows = _round_up(N, tm)
    n_cols = _round_up(N, tn)

    adj_i8 = jnp.zeros((n_rows, n_cols), jnp.int8).at[:N, :N].set(
        (adj != 0).astype(jnp.int8))
    h_pad = jnp.zeros((n_cols, f_pad), jnp.float32)
    h_pad = h_pad.at[:N, :f_out].set(h)
    h_pad = h_pad.at[:N, f_out].set(1.0)                       # ones column
    f1_pad = jnp.zeros((n_rows, 1), jnp.float32).at[:N, :].set(f1)
    f2_pad = jnp.zeros((1, n_cols), jnp.float32).at[:, :N].set(f2)

    kernel = functools.partial(_gat_kernel, alpha=float(alpha),
                               concat=bool(concat), f_out=f_out)

    out_pad = pl.pallas_call(
        kernel,
        out_shape=jax.ShapeDtypeStruct((n_rows, f_pad), jnp.float32),
        grid=(n_rows // tm, n_cols // tn),            # reduction (cols) axis last
        in_specs=[
            pl.BlockSpec((tm, tn), lambda i, j: (i, j)),       # adj tile (int8)
            pl.BlockSpec((tn, f_pad), lambda i, j: (j, 0)),    # h column block
            pl.BlockSpec((tm, 1), lambda i, j: (i, 0)),        # f1 row block
            pl.BlockSpec((1, tn), lambda i, j: (0, j)),        # f2 column block
        ],
        out_specs=pl.BlockSpec((tm, f_pad), lambda i, j: (i, 0)),
        scratch_shapes=[pltpu.VMEM((tm, f_pad), jnp.float32)],
        compiler_params=pltpu.CompilerParams(
            dimension_semantics=("parallel", "arbitrary")),
    )(adj_i8, h_pad, f1_pad, f2_pad)

    return out_pad[:N, :f_out].astype(x.dtype)


def _xavier_normal(key, shape, gain):
    fan_in, fan_out = shape[0], shape[1]
    std = gain * (2.0 / (fan_in + fan_out)) ** 0.5
    return std * jax.random.normal(key, shape, dtype=jnp.float32)


def _reference(x, adj, W, a, alpha, concat=True):
    """Pure-JAX reference mirroring the PyTorch dense-equivalent math."""
    f_out = W.shape[1]
    h = x @ W
    f1 = h @ a[:, :f_out].T            # (N, 1)
    f2 = h @ a[:, f_out:].T            # (N, 1)
    s = f1 + f2.T
    lrelu = jnp.where(s > 0, s, alpha * s)
    e = jnp.where(adj != 0, jnp.exp(-lrelu), 0.0)
    rowsum = e.sum(axis=1, keepdims=True)
    h_prime = (e @ h) / rowsum
    if concat:
        h_prime = jnp.where(h_prime > 0, h_prime, jnp.exp(h_prime) - 1.0)
    return h_prime


if __name__ == "__main__":
    key = jax.random.PRNGKey(0)
    k_x, k_adj, k_w, k_a = jax.random.split(key, 4)

    N = 200
    in_features = 16
    out_features = 32
    alpha = 0.2          # LeakyReLU negative slope

    # Deterministic inputs / parameters.
    x = jax.random.normal(k_x, (N, in_features), dtype=jnp.float32)
    adj = (jax.random.uniform(k_adj, (N, N)) < 0.1).astype(jnp.float32)
    adj = jnp.maximum(adj, jnp.eye(N, dtype=jnp.float32))   # self-loops (no empty rows)

    W = _xavier_normal(k_w, (in_features, out_features), gain=1.414)
    a = _xavier_normal(k_a, (1, 2 * out_features), gain=1.414)

    # Small tiles so the test exercises multi-row-tile + multi-step reduction
    # (grid = (2, 2) with padding 200 -> 256).
    out = sp_graph_attention_layer(x, adj, W, a, alpha=alpha, concat=True,
                                   block_m=128, block_n=128)
    out = jax.block_until_ready(out)
    ref = _reference(x, adj, W, a, alpha, concat=True)
    assert out.shape == (N, out_features)
    assert jnp.allclose(out, ref, atol=1e-4, rtol=1e-4), "mismatch vs reference (concat=True)"

    # Also check the concat=False branch with the default (production) tile sizes.
    out2 = sp_graph_attention_layer(x, adj, W, a, alpha=alpha, concat=False)
    out2 = jax.block_until_ready(out2)
    ref2 = _reference(x, adj, W, a, alpha, concat=False)
    assert jnp.allclose(out2, ref2, atol=1e-4, rtol=1e-4), "mismatch vs reference (concat=False)"

    print("KERNEL_OK")
</pallas_src>

<mosaic_0001>
module attributes {stable_mosaic.version = 11 : i64} {
  func.func @_gat_kernel(%arg0: i32, %arg1: i32, %arg2: memref<128x128xi8, #tpu.memory_space<vmem>>, %arg3: memref<128x128xf32, #tpu.memory_space<vmem>>, %arg4: memref<128x1xf32, #tpu.memory_space<vmem>>, %arg5: memref<1x128xf32, #tpu.memory_space<vmem>>, %arg6: memref<128x128xf32, #tpu.memory_space<vmem>>, %arg7: memref<128x128xf32, #tpu.memory_space<vmem>>) attributes {dimension_semantics = [#tpu.dimension_semantics<parallel>, #tpu.dimension_semantics<arbitrary>], iteration_bounds = array<i64: 2, 2>, scalar_prefetch = 0 : i64, scratch_operands = 1 : i64, tpu.core_type = #tpu.core_type<tc>, window_params = [{transform_indices = @transform_0, window_bounds = array<i64: 128, 128>}, {transform_indices = @transform_1, window_bounds = array<i64: 128, 128>}, {transform_indices = @transform_2, window_bounds = array<i64: 128, 1>}, {transform_indices = @transform_3, window_bounds = array<i64: 1, 128>}, {transform_indices = @transform_4, window_bounds = array<i64: 128, 128>}]} {
    %c0_i32 = arith.constant 0 : i32
    %0 = arith.cmpi eq, %arg1, %c0_i32 : i32
    %1 = arith.extui %0 : i1 to i32
    %c0_i32_0 = arith.constant 0 : i32
    %2 = arith.cmpi ne, %1, %c0_i32_0 : i32
    scf.if %2 {
      %cst_16 = arith.constant 0.000000e+00 : f32
      %27 = vector.broadcast %cst_16 : f32 to vector<128x128xf32>
      %c0_17 = arith.constant 0 : index
      %c0_18 = arith.constant 0 : index
      %28 = vector.load %arg7[%c0_17, %c0_18] : memref<128x128xf32, #tpu.memory_space<vmem>>, vector<128x128xf32>
      tpu.vector_store %arg7[%c0_17, %c0_18], %27 {strides = array<i32>} : memref<128x128xf32, #tpu.memory_space<vmem>>, vector<128x128xf32>,
    } else {
    }
    %c0 = arith.constant 0 : index
    %c0_1 = arith.constant 0 : index
    %3 = vector.load %arg4[%c0, %c0_1] : memref<128x1xf32, #tpu.memory_space<vmem>>, vector<128x1xf32>
    %c0_2 = arith.constant 0 : index
    %c0_3 = arith.constant 0 : index
    %4 = vector.load %arg5[%c0_2, %c0_3] : memref<1x128xf32, #tpu.memory_space<vmem>>, vector<1x128xf32>
    %5 = vector.broadcast %3 : vector<128x1xf32> to vector<128x128xf32>
    %6 = vector.broadcast %4 : vector<1x128xf32> to vector<128x128xf32>
    %7 = arith.addf %5, %6 : vector<128x128xf32>
    %cst = arith.constant 0.000000e+00 : f32
    %8 = vector.broadcast %cst : f32 to vector<128x128xf32>
    %9 = arith.cmpf ogt, %7, %8 : vector<128x128xf32>
    %cst_4 = arith.constant 2.000000e-01 : f32
    %10 = vector.broadcast %cst_4 : f32 to vector<128x128xf32>
    %11 = arith.mulf %10, %7 : vector<128x128xf32>
    %12 = arith.select %9, %7, %11 : vector<128x128xi1>, vector<128x128xf32>
    %c0_5 = arith.constant 0 : index
    %c0_6 = arith.constant 0 : index
    %13 = vector.load %arg2[%c0_5, %c0_6] : memref<128x128xi8, #tpu.memory_space<vmem>>, vector<128x128xi8>
    %14 = arith.sitofp %13 : vector<128x128xi8> to vector<128x128xf32>
    %cst_7 = arith.constant 0.000000e+00 : f32
    %15 = vector.broadcast %cst_7 : f32 to vector<128x128xf32>
    %16 = arith.subf %15, %12 : vector<128x128xf32>
    %17 = math.exp %16 : vector<128x128xf32>
    %18 = arith.mulf %14, %17 : vector<128x128xf32>
    %c0_8 = arith.constant 0 : index
    %c0_9 = arith.constant 0 : index
    %19 = vector.load %arg7[%c0_8, %c0_9] : memref<128x128xf32, #tpu.memory_space<vmem>>, vector<128x128xf32>
    %c0_10 = arith.constant 0 : index
    %c0_11 = arith.constant 0 : index
    %20 = vector.load %arg3[%c0_10, %c0_11] : memref<128x128xf32, #tpu.memory_space<vmem>>, vector<128x128xf32>
    %cst_12 = arith.constant dense<0.000000e+00> : vector<128x128xf32>
    %21 = tpu.matmul %18, %20, %cst_12 {dimension_numbers = #tpu.dot_dimension_numbers<[1], [0], [0], [1], [0, 0, 1, 1], [], []>} : vector<128x128xf32>, vector<128x128xf32>, vector<128x128xf32> -> vector<128x128xf32>
    %22 = arith.addf %19, %21 : vector<128x128xf32>
    %c0_13 = arith.constant 0 : index
    %c0_14 = arith.constant 0 : index
    %23 = vector.load %arg7[%c0_13, %c0_14] : memref<128x128xf32, #tpu.memory_space<vmem>>, vector<128x128xf32>
    tpu.vector_store %arg7[%c0_13, %c0_14], %22 {strides = array<i32>} : memref<128x128xf32, #tpu.memory_space<vmem>>, vector<128x128xf32>,
    %c1_i32 = arith.constant 1 : i32
    %24 = arith.cmpi eq, %arg1, %c1_i32 : i32
    %25 = arith.extui %24 : i1 to i32
    %c0_i32_15 = arith.constant 0 : i32
    %26 = arith.cmpi ne, %25, %c0_i32_15 : i32
    scf.if %26 {
      %c0_16 = arith.constant 0 : index
      %c0_17 = arith.constant 0 : index
      %27 = vector.load %arg7[%c0_16, %c0_17] : memref<128x128xf32, #tpu.memory_space<vmem>>, vector<128x128xf32>
      %28 = vector.extract_strided_slice %27 {offsets = [0, 32], sizes = [128, 1], strides = [1, 1]} : vector<128x128xf32> to vector<128x1xf32>
      %cst_18 = arith.constant 0.000000e+00 : f32
      %29 = vector.broadcast %cst_18 : f32 to vector<128x1xf32>
      %30 = arith.cmpf oeq, %28, %29 : vector<128x1xf32>
      %cst_19 = arith.constant 1.000000e+00 : f32
      %31 = vector.broadcast %cst_19 : f32 to vector<128x1xf32>
      %32 = arith.select %30, %31, %28 : vector<128x1xi1>, vector<128x1xf32>
      %33 = tpu.reciprocal %32 : vector<128x1xf32> -> vector<128x1xf32>
      %34 = vector.broadcast %33 : vector<128x1xf32> to vector<128x128xf32>
      %35 = arith.mulf %27, %34 : vector<128x128xf32>
      %cst_20 = arith.constant 0.000000e+00 : f32
      %36 = vector.broadcast %cst_20 : f32 to vector<128x128xf32>
      %37 = arith.cmpf ogt, %35, %36 : vector<128x128xf32>
      %cst_21 = arith.constant 0.000000e+00 : f32
      %38 = vector.broadcast %cst_21 : f32 to vector<128x128xf32>
      %39 = arith.minimumf %35, %38 : vector<128x128xf32>
      %40 = math.exp %39 : vector<128x128xf32>
      %cst_22 = arith.constant 1.000000e+00 : f32
      %41 = vector.broadcast %cst_22 : f32 to vector<128x128xf32>
      %42 = arith.subf %40, %41 : vector<128x128xf32>
      %43 = arith.select %37, %35, %42 : vector<128x128xi1>, vector<128x128xf32>
      %c0_23 = arith.constant 0 : index
      %c0_24 = arith.constant 0 : index
      %44 = vector.load %arg6[%c0_23, %c0_24] : memref<128x128xf32, #tpu.memory_space<vmem>>, vector<128x128xf32>
      tpu.vector_store %arg6[%c0_23, %c0_24], %43 {strides = array<i32>} : memref<128x128xf32, #tpu.memory_space<vmem>>, vector<128x128xf32>,
    } else {
    }
    return
  }
  func.func @transform_0(%arg0: i32, %arg1: i32) -> (i32, i32) {
    %c0_i32 = arith.constant 0 : i32
    return %arg0, %arg1 : i32, i32
  }
  func.func @transform_1(%arg0: i32, %arg1: i32) -> (i32, i32) {
    %c0_i32 = arith.constant 0 : i32
    %c0_i32_0 = arith.constant 0 : i32
    return %arg1, %c0_i32 : i32, i32
  }
  func.func @transform_2(%arg0: i32, %arg1: i32) -> (i32, i32) {
    %c0_i32 = arith.constant 0 : i32
    %c0_i32_0 = arith.constant 0 : i32
    return %arg0, %c0_i32 : i32, i32
  }
  func.func @transform_3(%arg0: i32, %arg1: i32) -> (i32, i32) {
    %c0_i32 = arith.constant 0 : i32
    %c0_i32_0 = arith.constant 0 : i32
    return %c0_i32, %arg1 : i32, i32
  }
  func.func @transform_4(%arg0: i32, %arg1: i32) -> (i32, i32) {
    %c0_i32 = arith.constant 0 : i32
    %c0_i32_0 = arith.constant 0 : i32
    return %arg0, %c0_i32 : i32, i32
  }
}

</mosaic_0001>

<bundles_post_ra>
// kernel: tpu_custom_call.1
= control target key start
LH: loop header
LB: loop body
LE: loop exit
PB: predicated region body
PF: predicated region fallthrough
CT: control target
= control target key end

     0   :  { %s2284_s0 = inlined_call_operand.hbm [shape: s8[256,256], index: 0, kind: input, shape index: {}]   ;;  %s2285_s1 = inlined_call_operand.vmem [shape: f32[256,128], index: 1, kind: input, shape index: {}]   ;;  %s2286_s2 = inlined_call_operand.vmem [shape: f32[256,1], index: 2, kind: input, shape index: {}]   ;;  %s2287_s3 = inlined_call_operand.vmem [shape: f32[1,256], index: 3, kind: input, shape index: {}]   ;;  %s2288_s4 = inlined_call_operand.hbm [shape: f32[256,128], index: 4, kind: output, shape index: {}]  }
   0x1   :  { %2295 = sst [smem:[#allocation14_spill]] %s2284_s0 }
   0x2   :  { %9 = vsyncpa [#allocation4], 0 }
   0x3   :  { %11 = vsyncpa [#allocation4 + $0x1], 0 }
   0x4   :  { %12 = vsyncpa [#allocation5], 0 }
   0x5   :  { %14 = vsyncpa [#allocation5 + $0x1], 0  ;;  %s1773_s15 = smov 0   ;;  %s1775_s16 = smov 0  }
   0x6   :  { %s1777_s17 = smov 0   ;;  %s1779_s18 = smov 0  }
   0x7   :  { %s1781_s19 = smov 0   ;;  %s1783_s20 = smov 0  }
   0x8   :  { %s1785_s21 = smov 0   ;;  %s1787_s22 = smov 0  }
   0x9   :  { %s1789_s23 = smov 0   ;;  %s1791_s24 = smov 0  }
   0xa   :  { %s1793_s25 = smov 0  }
   0xb LB: > { %2296 = sst [smem:[#allocation9_spill]] %s1728_s23  ;;  %s1197_s26 = sadd.s32 4294967295, %s1736_s25   ;;  %s1736_s25 = sphi %s1793_s25, %s20_s25   ;;  %s1732_s24 = sphi %s1791_s24, %s2314_s24   ;;  %s1728_s23 = sphi %s1789_s23, %s2313_s23   ;;  %s1724_s22 = sphi %s1787_s22, %s2312_s22   ;;  %s1720_s21 = sphi %s1785_s21, %s2311_s21   ;;  %s1716_s20 = sphi %s1783_s20, %s2320_s20   ;;  %s1712_s19 = sphi %s1781_s19, %s2319_s19   ;;  %s1708_s18 = sphi %s1779_s18, %s2318_s18   ;;  %s1704_s17 = sphi %s1777_s17, %s2317_s17   ;;  %s1700_s16 = sphi %s1775_s16, %s2316_s16   ;;  %s1696_s15 = sphi %s1773_s15, %s2315_s15  }
   0xc   : > { %2297 = sst [smem:[#allocation10_spill]] %s1732_s24  ;;  %s1198_s27 = sadd.s32 4294967294, %s1736_s25  }
   0xd   : > { %s29_s28 = sadd.s32 1, %s1728_s23  ;;  %s32_s29 = sadd.s32 1, %s1732_s24 }
   0xe   : > { %p30_p0 = scmp.ge.s32.totalorder %s29_s28, 2  ;;  %s41_s30 = sadd.s32 1, %s1716_s20 }
   0xf   : > { %p48_p1 = scmp.ne.s32.totalorder %s1716_s20, %s1712_s19  ;;  %p49_p2 = scmp.eq.s32.totalorder %s1736_s25, 0 }
  0x10   : > { %s2322_s28 = smov (%p30_p0, %s29_s28), 0  ;;  %s2324_s29 = smov (!%p30_p0, %s32_s29), %s1732_s24 }
  0x11   : > { %2298 = sst [smem:[#allocation11_spill]] %s2322_s28  ;;  %s37_s5 = ssub.s32 %s1728_s23, %s2322_s28 }
  0x12   : > { %p1839_p3 = por %p49_p2, %p48_p1  ;;  %p34_p4 = scmp.ge.s32.totalorder %s2324_s29, 2 }
  0x13   : > { %p54_p5 = scmp.ne.s32.totalorder %s1712_s19, %s1708_s18  ;;  %p55_p6 = scmp.eq.s32.totalorder %s1197_s26, 0 }
  0x14   : > { %s145_s7 = sadd.s32 1, %s1704_s17  ;;  %s2326_s29 = smov (%p34_p4, %s2324_s29), 0 }
  0x15   : > { %2300 = sst [smem:[#allocation12_spill]] %s2326_s29  ;;  %p1847_p7 = por %p55_p6, %p54_p5 }
  0x16   : > { %p155_p8 = scmp.ne.s32.totalorder %s1704_s17, %s1700_s16  ;;  %s36_s9 = ssub.s32 %s1732_s24, %s2326_s29 }
  0x17   : > { %p156_p9 = scmp.eq.s32.totalorder %s1197_s26, 3  ;;  %s38_s10 = sor.u32 %s37_s5, %s36_s9 }
  0x18   : > { %p143_p10 = scmp.eq.s32.totalorder %s36_s9, 0  ;;  %p39_p11 = scmp.eq.s32.totalorder %s38_s10, 0 }
  0x19   : > { %p1855_p12 = por %p156_p9, %p155_p8  ;;  %p161_p13 = scmp.ne.s32.totalorder %s1700_s16, %s1696_s15 }
  0x1a   : > { %s1860_s12 = scalar_select %p143_p10, %s1704_s17, %s145_s7  }
  0x1b   : > { %s2302_s11 = scalar_select %p1855_p12, 1, 0 }
  0x1c   : > { %2303 = sst [smem:[#allocation13_spill]] %s1860_s12  ;;  %p162_p0 = scmp.eq.s32.totalorder %s1198_s27, 3 }
  0x1d   : > { %s1863_s13 = scalar_select %p39_p11, %s1716_s20, %s41_s30  }
  0x1e   : > { %p1386_p1 = scmp.lt.s32.totalorder %s1736_s25, 4  ;;  %p1868_p2 = por %p162_p0, %p161_p13 }
  0x1f   : > { %s182_s18 = sand.u32 1, %s1716_s20   ;;  %s1236_s5 = sshll.u32 %s1732_s24, 3 }
  0x20   : > { %s2304_s14 = scalar_select %p1868_p2, 1, 0 }
  0x21   : > { %s1201_s26 = sshll.u32 %s182_s18, 5  ;;  %s192_s9 = sadd.s32 %s1728_s23, %s1236_s5 }
  0x22   : > { %s186_s10 = scalar_lea.vmem [#allocation3], %s1201_s26  ;;  %s1204_s28 = sshll.u32 %s192_s9, 7 }
  0x23   : > { %s195_s29 = sshll.u32 %s186_s10, 4  ;;  %s2305_s0 = sld [smem:[#allocation14_spill]]  ;;  %s1875_s29 = int_to_ptr.vmem [resolvable:$true] %s195_s29 }
  0x24   : > { %p1884_p4 = pnand %p1386_p1, %p1839_p3  ;;  %s1888_s26 = scalar_lea.sflag [#allocation4], %s182_s18 }
  0x26   : > { %p1586_p6 = pneg %p1884_p4 }
  0x29   : > { %s1880_s30 = scalar_lea.hbm %s2305_s0, %s1204_s28  ;;  %s1589_s12 = scalar_lea.hbm %s2305_s0, 2048 }
  0x2a   : > { %s1584_s5 = scalar_lea.hbm %s1880_s30, 512  ;;  %p1590_p3 = scmp.lt.u32.totalorder %s1880_s30, %s2305_s0 }
  0x2b   : > { %p1585_p5 = scmp.ne.s32.totalorder %s1880_s30, %s1584_s5  ;;  %p1591_p10 = scmp.lt.u32.totalorder %s1589_s12, %s1584_s5 }
  0x2c   : > { %p1593_p13 = scmp.lt.u32.totalorder %s1584_s5, %s1880_s30 }
  0x2d   : > { %p1587_p8 = pnand %p1586_p6, %p1585_p5  ;;  %p1592_p11 = por %p1591_p10, %p1590_p3 }
  0x2f   : > { %p1588_p9 = pneg %p1587_p8  ;;  %p1594_p0 = por %p1593_p13, %p1592_p11 }
  0x31   : > { %p1595_p1 = pnand %p1594_p0, %p1588_p9 }
  0x33   : > { %1598 = shalt.err (!%p1595_p1)
}
  0x34   : > { %s1599_s18 = scalar_lea.vmem %s1875_s29, 512  ;;  %s1738_s7 = smov [#allocation3]  }
  0x35   : > { %p1600_p5 = scmp.ne.s32.totalorder %s1875_s29, %s1599_s18  ;;  %s1604_s28 = sshll.u32 %s1738_s7, 4  ;;  %s1605_s28 = int_to_ptr.vmem [resolvable:$false] %s1604_s28 }
  0x36   : > { %s1606_s6 = scalar_lea.vmem %s1605_s28, 1024  ;;  %p1607_p12 = scmp.lt.s32.totalorder %s1875_s29, %s1605_s28 }
  0x37   : > { %p1602_p8 = pnand %p1600_p5, %p1586_p6  ;;  %p1608_p3 = scmp.lt.s32.totalorder %s1606_s6, %s1599_s18 }
  0x39   : > { %p1603_p2 = pneg %p1602_p8  ;;  %p1609_p10 = por %p1608_p3, %p1607_p12 }
  0x3b   : > { %p1610_p11 = pnand %p1609_p10, %p1603_p2 }
  0x3d   : > { %1613 = shalt.err (!%p1610_p11)
}
  0x3e   : > { %s1739_s5 = smov 256   ;;  %s1740_s12 = smov 128  }
  0x3f   : > { %s1741_s9 = smov 8   ;;  %p1205_p6 = scmp.ge.s32.totalorder %s1736_s25, 1 }
  0x40   : > { %1381 = dma.hbm_to_vmem [thread:$0]  (!%p1884_p4), %s1880_s30, 512, %s1875_s29, %s1888_s26, %s1739_s5, %s1740_s12, %s1741_s9  }
  0x41   : > { %p227_p9 = scmp.lt.s32.totalorder %s1736_s25, 5 }
  0x43   : > { %p228_p13 = pnand %p1205_p6, %p227_p9 }
  0x44   : > { %s233_s10 = sand.u32 (!%p228_p13), 1, %s1712_s19  }
  0x45   : > { %231 = sbr.rel (%p228_p13) target bundleno = 704 (0x2c0), region = 36  ;;  %s1206_s18 = sshll.u32 (!%p228_p13), %s233_s10, 5 }
  0x46   : > { %s234_s7 = scalar_lea.sflag (!%p228_p13), [#allocation4], %s233_s10  ;;  %s1919_s28 = scalar_lea.vmem (!%p228_p13), [#allocation3], %s1206_s18 }
  0x4c   : > { %1687 = dma.done.wait (%p1847_p7), %s234_s7, 512  }
  0x4d   : > { %1689 = vsyncadd (%p1847_p7), %s234_s7, 4294966784  ;;  %s2292_s29 = sand.u32 1, %s1700_s16   ;;  %s1208_s30 = sshll.u32 %s1720_s21, 4 }
  0x4e   : > { %s1207_s27 = sshll.u32 %s2292_s29, 7  ;;  %p277_p12 = scmp.lt.s32.totalorder %s1208_s30, 31 }
  0x4f   : > { %s1210_s26 = sshll.u32 %s1724_s22, 4  ;;  %p288_p4 = scmp.lt.s32.totalorder %s1720_s21, 1 }
  0x50   : > { %s2328_s30 = smov (!%p277_p12, %s1208_s30), 31  ;;  %p283_p2 = scmp.lt.s32.totalorder %s1210_s26, 31 }
  0x51   : > { %s1209_s6 = sshll.u32 %s2328_s30, 3  ;;  %s1948_s30 = scalar_lea.vmem [#allocation6], %s1207_s27 }
  0x52   : > { %s1934_s8 = scalar_lea.vmem %s2285_s1, %s1209_s6  ;;  %s2330_s26 = smov (!%p283_p2, %s1210_s26), 31 }
  0x53   : > { %s1937_s9 = scalar_select %p288_p4, %s1720_s21, 1 }
  0x54   : > { %s1211_s10 = sshll.u32 %s2330_s26, 3  ;;  %p1212_p7 = scmp.ne.s32.totalorder %s1720_s21, 0 }
  0x55   : > { %s1942_s29 = scalar_lea.vmem %s2286_s2, %s1211_s10  ;;  %s290_s23 = scalar_lea.vmem %s2287_s3, %s1937_s9  ;;  %v1742_v0 = vmov (!%p1212_p7), 0.0  }
  0x56   : > { %295 = sbr.rel (%p1212_p7) target bundleno = 94 (0x5e), region = 44  ;;  %296 = vst [vmem:[#allocation2] sm:$0xff] (!%p1212_p7), %v1742_v0  ;;  %297 = vst [vmem:[#allocation2 + $0x8] sm:$0xff] (!%p1212_p7), %v1742_v0 }
  0x57   : > { %298 = vst [vmem:[#allocation2 + $0x10] sm:$0xff] (!%p1212_p7), %v1742_v0  ;;  %299 = vst [vmem:[#allocation2 + $0x18] sm:$0xff] (!%p1212_p7), %v1742_v0 }
  0x58   : > { %300 = vst [vmem:[#allocation2 + $0x20] sm:$0xff] (!%p1212_p7), %v1742_v0  ;;  %301 = vst [vmem:[#allocation2 + $0x28] sm:$0xff] (!%p1212_p7), %v1742_v0 }
  0x59   : > { %302 = vst [vmem:[#allocation2 + $0x30] sm:$0xff] (!%p1212_p7), %v1742_v0  ;;  %303 = vst [vmem:[#allocation2 + $0x38] sm:$0xff] (!%p1212_p7), %v1742_v0 }
  0x5a   : > { %304 = vst [vmem:[#allocation2 + $0x40] sm:$0xff] (!%p1212_p7), %v1742_v0  ;;  %305 = vst [vmem:[#allocation2 + $0x48] sm:$0xff] (!%p1212_p7), %v1742_v0 }
  0x5b   : > { %306 = vst [vmem:[#allocation2 + $0x50] sm:$0xff] (!%p1212_p7), %v1742_v0  ;;  %307 = vst [vmem:[#allocation2 + $0x58] sm:$0xff] (!%p1212_p7), %v1742_v0 }
  0x5c   : > { %308 = vst [vmem:[#allocation2 + $0x60] sm:$0xff] (!%p1212_p7), %v1742_v0  ;;  %309 = vst [vmem:[#allocation2 + $0x68] sm:$0xff] (!%p1212_p7), %v1742_v0 }
  0x5d   : > { %310 = vst [vmem:[#allocation2 + $0x70] sm:$0xff] %v1742_v0  ;;  %311 = vst [vmem:[#allocation2 + $0x78] sm:$0xff] %v1742_v0 }
  0x5e PF: > { %v313_v1 = vld [vmem:[%s1942_s29 + $0x8] sm:$0xff]  ;;  %v312_v2 = vld [vmem:[%s1942_s29] sm:$0xff]  ;;  %v1743_v3 = vmov 0   ;;  %v597_v9 = vld [vmem:[%s1934_s8 + $0x10] sm:$0xff]  ;;  %p1214_p0 = scmp.ne.s32.totalorder %s1720_s21, 1 }
  0x5f   : > { %1485 = vset.pattern.permute.xlu1 %v1743_v3  ;;  %1484 = vset.pattern.permute.xlu0 %v1743_v3  ;;  %v321_v4 = vld [vmem:[%s1942_s29 + $0x48] sm:$0xff]  ;;  %v320_v5 = vld [vmem:[%s1942_s29 + $0x40] sm:$0xff]  ;;  %v598_v10 = vld [vmem:[%s1934_s8 + $0x18] sm:$0xff] }
  0x60   : > { %336 = vperm.xlu1 %1485, %v313_v1   ;;  %331 = vperm.xlu0 %1484, %v312_v2   ;;  %v595_v6 = vld [vmem:[%s1934_s8] sm:$0xff]  ;;  %v596_v7 = vld [vmem:[%s1934_s8 + $0x8] sm:$0xff]  ;;  %v322_v11 = vld [vmem:[%s1942_s29 + $0x50] sm:$0xff]  ;;  %v1330_v13 = vpack.c.bf16 %v598_v10, %v597_v9 }
  0x61   : > { %v1326_v8 = vpack.c.bf16 %v596_v7, %v595_v6  ;;  %v314_v12 = vld [vmem:[%s1942_s29 + $0x10] sm:$0xff]  ;;  %v599_v14 = vld [vmem:[%s1934_s8 + $0x20] sm:$0xff]  ;;  %v600_v15 = vld [vmem:[%s1934_s8 + $0x28] sm:$0xff] }
  0x62   : > { %v323_v16 = vld [vmem:[%s1942_s29 + $0x58] sm:$0xff]  ;;  %v1334_v18 = vpack.c.bf16 %v600_v15, %v599_v14  ;;  %v601_v19 = vld [vmem:[%s1934_s8 + $0x30] sm:$0xff]  ;;  %v324_v21 = vld [vmem:[%s1942_s29 + $0x60] sm:$0xff] }
  0x63   : > { %1327 = vmatprep.subr.bf16.mxu0 %v1326_v8  ;;  %1358 = vmatprep.subr.bf16.mxu1 %v1326_v8  ;;  %v315_v17 = vld [vmem:[%s1942_s29 + $0x18] sm:$0xff]  ;;  %v316_v22 = vld [vmem:[%s1942_s29 + $0x20] sm:$0xff]  ;;  %v604_v25 = vld [vmem:[%s1934_s8 + $0x48] sm:$0xff] }
  0x64   : > { %376 = vperm.xlu1 %1485, %v321_v4   ;;  %371 = vperm.xlu0 %1484, %v320_v5   ;;  %v602_v20 = vld [vmem:[%s1934_s8 + $0x38] sm:$0xff]  ;;  %v603_v24 = vld [vmem:[%s1934_s8 + $0x40] sm:$0xff]  ;;  %v325_v26 = vld [vmem:[%s1942_s29 + $0x68] sm:$0xff] }
  0x65   : > { %1329 = vmatpush3.bf16.msra.mxu0 %v1326_v8  ;;  %1366 = vmatpush3.bf16.msra.mxu1 %v1326_v8  ;;  %v1338_v23 = vpack.c.bf16 %v602_v20, %v601_v19  ;;  %v317_v27 = vld [vmem:[%s1942_s29 + $0x28] sm:$0xff]  ;;  %v1342_v28 = vpack.c.bf16 %v604_v25, %v603_v24  ;;  %v605_v29 = vld [vmem:[%s1934_s8 + $0x50] sm:$0xff]  ;;  %v606_v30 = vld [vmem:[%s1934_s8 + $0x58] sm:$0xff] }
  0x66   : > { %1331 = vmatprep.subr.bf16.mxu0 %v1330_v13  ;;  %1359 = vmatprep.subr.bf16.mxu1 %v1330_v13  ;;  %v326_v31 = vld [vmem:[%s1942_s29 + $0x70] sm:$0xff]  ;;  %v1346_v33 = vpack.c.bf16 %v606_v30, %v605_v29  ;;  %v607_v34 = vld [vmem:[%s1934_s8 + $0x60] sm:$0xff]  ;;  %v608_v35 = vld [vmem:[%s1934_s8 + $0x68] sm:$0xff] }
  0x67   : > { %v318_v32 = vld [vmem:[%s1942_s29 + $0x30] sm:$0xff]  ;;  %v327_v36 = vld [vmem:[%s1942_s29 + $0x78] sm:$0xff]  ;;  %v1350_v38 = vpack.c.bf16 %v608_v35, %v607_v34  ;;  %v479_v42 = vld [vmem:[%s1919_s28] sm:$0xff] }
  0x68   : > { %381 = vperm.xlu1 %1485, %v322_v11   ;;  %341 = vperm.xlu0 %1484, %v314_v12   ;;  %v319_v37 = vld [vmem:[%s1942_s29 + $0x38] sm:$0xff]  ;;  %v609_v39 = vld [vmem:[%s1934_s8 + $0x70] sm:$0xff]  ;;  %v1992_v44 = vld [vmem:[%s290_s23] ss:$0 sm:$0xff]  ;;  %v483_v45 = vunpack.c.0.s8 %v479_v42  ;;  %v484_v48 = vunpack.c.1.s8 %v479_v42  ;;  %v485_v54 = vunpack.c.2.s8 %v479_v42  ;;  %v486_v6 = vunpack.c.3.s8 %v479_v42 }
  0x69   : > { %1333 = vmatpush3.bf16.msra.mxu0 %v1330_v13  ;;  %1367 = vmatpush3.bf16.msra.mxu1 %v1330_v13  ;;  %v610_v40 = vld [vmem:[%s1934_s8 + $0x78] sm:$0xff]  ;;  %v1985_v43 = vld [vmem:[%s1919_s28 + $0x10] sm:$0xff]  ;;  %v2017_v19 = vld [vmem:[%s1919_s28 + $0x8] sm:$0xff] }
  0x6a   : > { %1335 = vmatprep.subr.bf16.mxu0 %v1334_v18  ;;  %1360 = vmatprep.subr.bf16.mxu1 %v1334_v18  ;;  %v1354_v41 = vpack.c.bf16 %v610_v40, %v609_v39  ;;  %v491_v49 = vunpack.c.0.s8 %v1985_v43  ;;  %v492_v50 = vunpack.c.1.s8 %v1985_v43  ;;  %v1998_v53 = vcvt.s32.f32 %v483_v45  ;;  %v2022_v24 = vld [vmem:[%s1919_s28 + $0x18] sm:$0xff] }
  0x6b   : > { %v2000_v59 = vcvt.s32.f32 %v484_v48  ;;  %v493_v62 = vunpack.c.2.s8 %v1985_v43  ;;  %v2009_v5 = vcvt.s32.f32 %v485_v54  ;;  %v494_v14 = vunpack.c.3.s8 %v1985_v43 }
  0x6c   : > { %386 = vperm.xlu1 %1485, %v323_v16   ;;  %346 = vperm.xlu0 %1484, %v315_v17   ;;  %v2002_v60 = vcvt.s32.f32 %v491_v49  ;;  %v2004_v61 = vcvt.s32.f32 %v492_v50  ;;  %v487_v30 = vunpack.c.0.s8 %v2017_v19 }
  0x6d   : > { %1337 = vmatpush3.bf16.msra.mxu0 %v1334_v18  ;;  %1368 = vmatpush3.bf16.msra.mxu1 %v1334_v18  ;;  %v2011_v13 = vcvt.s32.f32 %v493_v62  ;;  %v2027_v34 = vcvt.s32.f32 %v494_v14 }
  0x6e   : > { %1339 = vmatprep.subr.bf16.mxu0 %v1338_v23  ;;  %1361 = vmatprep.subr.bf16.mxu1 %v1338_v23  ;;  %v2030_v45 = vcvt.s32.f32 %v487_v30 }
  0x70   : > { %391 = vperm.xlu1 %1485, %v324_v21   ;;  %351 = vperm.xlu0 %1484, %v316_v22   ;;  %v2019_v22 = vcvt.s32.f32 %v486_v6 }
  0x71   : > { %1341 = vmatpush3.bf16.msra.mxu0 %v1338_v23  ;;  %1369 = vmatpush3.bf16.msra.mxu1 %v1338_v23 }
  0x72   : > { %1343 = vmatprep.subr.bf16.mxu0 %v1342_v28  ;;  %1362 = vmatprep.subr.bf16.mxu1 %v1342_v28 }
  0x74   : > { %396 = vperm.xlu1 %1485, %v325_v26   ;;  %356 = vperm.xlu0 %1484, %v317_v27  }
  0x75   : > { %1345 = vmatpush3.bf16.msra.mxu0 %v1342_v28  ;;  %1370 = vmatpush3.bf16.msra.mxu1 %v1342_v28 }
  0x76   : > { %1347 = vmatprep.subr.bf16.mxu0 %v1346_v33  ;;  %1363 = vmatprep.subr.bf16.mxu1 %v1346_v33 }
  0x78   : > { %401 = vperm.xlu1 %1485, %v326_v31   ;;  %361 = vperm.xlu0 %1484, %v318_v32  }
  0x79   : > { %1349 = vmatpush3.bf16.msra.mxu0 %v1346_v33  ;;  %1371 = vmatpush3.bf16.msra.mxu1 %v1346_v33 }
  0x7a   : > { %1351 = vmatprep.subr.bf16.mxu0 %v1350_v38  ;;  %1364 = vmatprep.subr.bf16.mxu1 %v1350_v38 }
  0x7c   : > { %406 = vperm.xlu1 %1485, %v327_v36   ;;  %366 = vperm.xlu0 %1484, %v319_v37   ;;  %v495_v37 = vunpack.c.0.s8 %v2022_v24 }
  0x7d   : > { %1353 = vmatpush3.bf16.msra.mxu0 %v1350_v38  ;;  %1372 = vmatpush3.bf16.msra.mxu1 %v1350_v38 }
  0x7e   : > { %1355 = vmatprep.subr.bf16.mxu0 %v1354_v41  ;;  %1365 = vmatprep.subr.bf16.mxu1 %v1354_v41 }
  0x81   : > { %1357 = vmatpush3.bf16.msra.mxu0 %v1354_v41  ;;  %1373 = vmatpush3.bf16.msra.mxu1 %v1354_v41 }
  0xdf   : > { %v337_v46 = vpop.permute.xlu1 %336  ;;  %v332_v47 = vpop.permute.xlu0 %331 }
  0xe0   : > { %v416_v51 = vadd.f32 %v1992_v44, %v337_v46  ;;  %v415_v52 = vadd.f32 %v1992_v44, %v332_v47 }
  0xe2   : > { %vm432_vm0 = vcmp.gt.f32.partialorder %v416_v51, 0.0  ;;  %v448_v55 = vmul.f32 0.2, %v416_v51  ;;  %vm431_vm1 = vcmp.gt.f32.partialorder %v415_v52, 0.0  ;;  %v447_v56 = vmul.f32 0.2, %v415_v52 }
  0xe3   : > { %v377_v57 = vpop.permute.xlu1 %376  ;;  %v372_v58 = vpop.permute.xlu0 %371 }
  0xe4   : > { %v464_v63 = vsel %vm432_vm0, %v416_v51, %v448_v55  ;;  %v463_v0 = vsel %vm431_vm1, %v415_v52, %v447_v56  ;;  %v424_v1 = vadd.f32 %v1992_v44, %v377_v57  ;;  %v423_v2 = vadd.f32 %v1992_v44, %v372_v58 }
  0xe5   : > { %v516_v3 = vsub.f32 0.0, %v464_v63  ;;  %v515_v4 = vsub.f32 0.0, %v463_v0  ;;  %v2034_v52 = vcvt.s32.f32 %v495_v37  ;;  %v488_v0 = vunpack.c.1.s8 %v2017_v19 }
  0xe6   : > { %vm440_vm2 = vcmp.gt.f32.partialorder %v424_v1, 0.0  ;;  %v456_v7 = vmul.f32 0.2, %v424_v1  ;;  %vm439_vm3 = vcmp.gt.f32.partialorder %v423_v2, 0.0  ;;  %v455_v8 = vmul.f32 0.2, %v423_v2 }
  0xe7   : > { %v533_v9 = vmul.f32 1.442695, %v516_v3  ;;  %v531_v10 = vmul.f32 1.442695, %v515_v4  ;;  %v382_v11 = vpop.permute.xlu1 %381  ;;  %v342_v12 = vpop.permute.xlu0 %341 }
  0xe8   : > { %v472_v15 = vsel %vm440_vm2, %v424_v1, %v456_v7  ;;  %v471_v16 = vsel %vm439_vm3, %v423_v2, %v455_v8  ;;  %v425_v17 = vadd.f32 %v1992_v44, %v382_v11  ;;  %v417_v18 = vadd.f32 %v1992_v44, %v342_v12 }
  0xe9   : > { %1486 = vpow2.f32 %v533_v9  ;;  %v524_v20 = vsub.f32 0.0, %v472_v15  ;;  %v523_v21 = vsub.f32 0.0, %v471_v16 }
  0xea   : > { %1488 = vpow2.f32 %v531_v10  ;;  %vm441_vm4 = vcmp.gt.f32.partialorder %v425_v17, 0.0  ;;  %v457_v23 = vmul.f32 0.2, %v425_v17  ;;  %vm433_vm5 = vcmp.gt.f32.partialorder %v417_v18, 0.0 }
  0xeb   : > { %v549_v25 = vmul.f32 1.442695, %v524_v20  ;;  %v547_v26 = vmul.f32 1.442695, %v523_v21  ;;  %v449_v27 = vmul.f32 0.2, %v417_v18  ;;  %v387_v28 = vpop.permute.xlu1 %386  ;;  %v347_v29 = vpop.permute.xlu0 %346 }
  0xec   : > { %v473_v31 = vsel %vm441_vm4, %v425_v17, %v457_v23  ;;  %v426_v32 = vadd.f32 %v1992_v44, %v387_v28  ;;  %v418_v33 = vadd.f32 %v1992_v44, %v347_v29 }
  0xed   : > { %1490 = vpow2.f32 %v549_v25  ;;  %v525_v35 = vsub.f32 0.0, %v473_v31  ;;  %v465_v36 = vsel %vm433_vm5, %v417_v18, %v449_v27 }
  0xee   : > { %1492 = vpow2.f32 %v547_v26  ;;  %v517_v38 = vsub.f32 0.0, %v465_v36  ;;  %vm442_vm6 = vcmp.gt.f32.partialorder %v426_v32, 0.0  ;;  %v458_v39 = vmul.f32 0.2, %v426_v32 }
  0xef   : > { %v551_v40 = vmul.f32 1.442695, %v525_v35  ;;  %vm434_vm7 = vcmp.gt.f32.partialorder %v418_v33, 0.0  ;;  %v450_v41 = vmul.f32 0.2, %v418_v33  ;;  %v392_v42 = vpop.permute.xlu1 %391  ;;  %v352_v43 = vpop.permute.xlu0 %351 }
  0xf0   : > { %v535_v46 = vmul.f32 1.442695, %v517_v38  ;;  %v474_v47 = vsel %vm442_vm6, %v426_v32, %v458_v39  ;;  %v427_v48 = vadd.f32 %v1992_v44, %v392_v42  ;;  %v419_v49 = vadd.f32 %v1992_v44, %v352_v43 }
  0xf1   : > { %1494 = vpow2.f32 %v551_v40  ;;  %v526_v50 = vsub.f32 0.0, %v474_v47  ;;  %v466_v51 = vsel %vm434_vm7, %v418_v33, %v450_v41 }
  0xf2   : > { %1496 = vpow2.f32 %v535_v46  ;;  %v518_v54 = vsub.f32 0.0, %v466_v51  ;;  %vm443_vm8 = vcmp.gt.f32.partialorder %v427_v48, 0.0  ;;  %v459_v55 = vmul.f32 0.2, %v427_v48 }
  0xf3   : > { %v1487_v56 = vpop.eup %1486  ;;  %v553_v57 = vmul.f32 1.442695, %v526_v50  ;;  %vm435_vm9 = vcmp.gt.f32.partialorder %v419_v49, 0.0  ;;  %v451_v58 = vmul.f32 0.2, %v419_v49  ;;  %v397_v62 = vpop.permute.xlu1 %396 }
  0xf4   : > { %v357_v63 = vpop.permute.xlu0 %356  ;;  %v1489_v1 = vpop.eup %1488  ;;  %v537_v2 = vmul.f32 1.442695, %v518_v54  ;;  %v475_v3 = vsel %vm443_vm8, %v427_v48, %v459_v55  ;;  %v428_v4 = vadd.f32 %v1992_v44, %v397_v62  ;;  %v564_v17 = vmul.f32 %v1487_v56, %v2000_v59 }
  0xf5   : > { %v420_v6 = vadd.f32 %v1992_v44, %v357_v63  ;;  %1498 = vpow2.f32 %v553_v57  ;;  %v527_v7 = vsub.f32 0.0, %v475_v3  ;;  %v467_v8 = vsel %vm435_vm9, %v419_v49, %v451_v58 }
  0xf6   : > { %v563_v9 = vmul.f32 %v1489_v1, %v1998_v53  ;;  %1500 = vpow2.f32 %v537_v2  ;;  %v519_v10 = vsub.f32 0.0, %v467_v8  ;;  %vm444_vm10 = vcmp.gt.f32.partialorder %v428_v4, 0.0 }
  0xf7   : > { %v460_v11 = vmul.f32 0.2, %v428_v4  ;;  %v1491_v12 = vpop.eup %1490  ;;  %v555_v14 = vmul.f32 1.442695, %v527_v7  ;;  %vm436_vm11 = vcmp.gt.f32.partialorder %v420_v6, 0.0  ;;  %v402_v16 = vpop.permute.xlu1 %401  ;;  %v496_v56 = vunpack.c.1.s8 %v2022_v24 }
  0xf8   : > { %v452_v15 = vmul.f32 0.2, %v420_v6  ;;  %1302 = vmatprep.mubr.f32.mxu0 %v563_v9  ;;  %v362_v18 = vpop.permute.xlu0 %361  ;;  %v1493_v20 = vpop.eup %1492  ;;  %v539_v21 = vmul.f32 1.442695, %v519_v10  ;;  %v429_v25 = vadd.f32 %v1992_v44, %v402_v16  ;;  %v572_v35 = vmul.f32 %v1491_v12, %v2004_v61 }
  0xf9   : > { %v476_v23 = vsel %vm444_vm10, %v428_v4, %v460_v11  ;;  %v421_v53 = vadd.f32 %v1992_v44, %v362_v18  ;;  %1502 = vpow2.f32 %v555_v14  ;;  %1303 = vmatmul.mubr.f32.vlgmr.msra.gmra.mrb[0].mxu0 %v564_v17  ;;  %v571_v28 = vmul.f32 %v1493_v20, %v2002_v60 }
  0xfa   : > { %v528_v26 = vsub.f32 0.0, %v476_v23  ;;  %v468_v27 = vsel %vm436_vm11, %v420_v6, %v452_v15  ;;  %1504 = vpow2.f32 %v539_v21  ;;  %vm445_vm12 = vcmp.gt.f32.partialorder %v429_v25, 0.0 }
  0xfb   : > { %v520_v29 = vsub.f32 0.0, %v468_v27  ;;  %v461_v30 = vmul.f32 0.2, %v429_v25  ;;  %v1495_v31 = vpop.eup %1494  ;;  %vm437_vm13 = vcmp.gt.f32.partialorder %v421_v53, 0.0  ;;  %v453_v32 = vmul.f32 0.2, %v421_v53  ;;  %1314 = vmatprep.mubr.f32.mxu1 %v571_v28  ;;  %v407_v33 = vpop.permute.xlu1 %406 }
  0xfc   : > { %v557_v59 = vmul.f32 1.442695, %v528_v26  ;;  %v367_v36 = vpop.permute.xlu0 %366  ;;  %v1497_v37 = vpop.eup %1496  ;;  %v430_v40 = vadd.f32 %v1992_v44, %v407_v33  ;;  %1315 = vmatmul.mubr.f32.vlgmr.msra.gmra.mrb[0].mxu1 %v572_v35  ;;  %v573_v50 = vmul.f32 %v1495_v31, %v2011_v13  ;;  %v512_v4 = vcvt.s32.f32 %v496_v56  ;;  %v579_v26 = vld [vmem:[#allocation2] sm:$0xff] }
  0xfd   : > { %v541_v38 = vmul.f32 1.442695, %v520_v29  ;;  %v477_v39 = vsel %vm445_vm12, %v429_v25, %v461_v30  ;;  %v422_v60 = vadd.f32 %v1992_v44, %v367_v36  ;;  %v469_v42 = vsel %vm437_vm13, %v421_v53, %v453_v32  ;;  %v588_v30 = vld [vmem:[#allocation2 + $0x48] sm:$0xff]  ;;  %v587_v31 = vld [vmem:[#allocation2 + $0x40] sm:$0xff]  ;;  %v590_v36 = vld [vmem:[#allocation2 + $0x58] sm:$0xff] }
  0xfe   : > { %1506 = vpow2.f32 %v557_v59  ;;  %v529_v41 = vsub.f32 0.0, %v477_v39  ;;  %v565_v43 = vmul.f32 %v1497_v37, %v2009_v5  ;;  %v521_v46 = vsub.f32 0.0, %v469_v42  ;;  %1317 = vmatprep.mubr.f32.mxu1 %v573_v50  ;;  %v582_v37 = vld [vmem:[#allocation2 + $0x18] sm:$0xff]  ;;  %v591_v50 = vld [vmem:[#allocation2 + $0x60] sm:$0xff] }
  0xff   : > { %1508 = vpow2.f32 %v541_v38  ;;  %vm446_vm14 = vcmp.gt.f32.partialorder %v430_v40, 0.0  ;;  %v462_v47 = vmul.f32 0.2, %v430_v40  ;;  %v1499_v48 = vpop.eup %1498  ;;  %vm438_vm15 = vcmp.gt.f32.partialorder %v422_v60, 0.0  ;;  %v589_v38 = vld [vmem:[#allocation2 + $0x50] sm:$0xff] }
 0x100   : > { %v559_v61 = vmul.f32 1.442695, %v529_v41  ;;  %v454_v49 = vmul.f32 0.2, %v422_v60  ;;  %1305 = vmatprep.mubr.f32.mxu0 %v565_v43  ;;  %v1501_v51 = vpop.eup %1500  ;;  %v543_v54 = vmul.f32 1.442695, %v521_v46  ;;  %v574_v55 = vmul.f32 %v1499_v48, %v2027_v34 }
 0x101   : > { %v478_v44 = vsel %vm446_vm14, %v430_v40, %v462_v47  ;;  %v566_v58 = vmul.f32 %v1501_v51, %v2019_v22  ;;  %v497_v34 = vunpack.c.2.s8 %v2022_v24  ;;  %v504_v7 = vcvt.s32.f32 %v488_v0  ;;  %v581_v40 = vld [vmem:[#allocation2 + $0x10] sm:$0xff] }
 0x102   : > { %1510 = vpow2.f32 %v559_v61  ;;  %v530_v5 = vsub.f32 0.0, %v478_v44  ;;  %v470_v57 = vsel %vm438_vm15, %v422_v60, %v454_v49  ;;  %1318 = vmatmul.mubr.f32.gmra.mrb[2].mxu1 %v574_v55  ;;  %v489_v22 = vunpack.c.2.s8 %v2017_v19  ;;  %v592_v61 = vld [vmem:[#allocation2 + $0x68] sm:$0xff] }
 0x103   : > { %1512 = vpow2.f32 %v543_v54  ;;  %v522_v62 = vsub.f32 0.0, %v470_v57  ;;  %v1503_v63 = vpop.eup %1502  ;;  %1306 = vmatmul.mubr.f32.gmra.mrb[2].mxu0 %v566_v58  ;;  %v513_v11 = vcvt.s32.f32 %v497_v34  ;;  %v490_v15 = vunpack.c.3.s8 %v2017_v19  ;;  %v584_v49 = vld [vmem:[#allocation2 + $0x28] sm:$0xff]  ;;  %v583_v54 = vld [vmem:[#allocation2 + $0x20] sm:$0xff] }
 0x104   : > { %v561_v1 = vmul.f32 1.442695, %v530_v5  ;;  %v1505_v13 = vpop.eup %1504  ;;  %v575_v3 = vmul.f32 %v1503_v63, %v2034_v52  ;;  %v498_v52 = vunpack.c.3.s8 %v2022_v24  ;;  %v505_v14 = vcvt.s32.f32 %v489_v22  ;;  %v580_v24 = vld [vmem:[#allocation2 + $0x8] sm:$0xff]  ;;  %v594_v63 = vld [vmem:[#allocation2 + $0x78] sm:$0xff] }
 0x105   : > { %v545_v2 = vmul.f32 1.442695, %v522_v62  ;;  %v567_v6 = vmul.f32 %v1505_v13, %v2030_v45  ;;  %v506_v20 = vcvt.s32.f32 %v490_v15  ;;  %v593_v13 = vld [vmem:[#allocation2 + $0x70] sm:$0xff] }
 0x106   : > { %1514 = vpow2.f32 %v561_v1  ;;  %1320 = vmatprep.mubr.f32.mxu1 %v575_v3  ;;  %v514_v17 = vcvt.s32.f32 %v498_v52  ;;  %v586_v1 = vld [vmem:[#allocation2 + $0x38] sm:$0xff]  ;;  %v585_v3 = vld [vmem:[#allocation2 + $0x30] sm:$0xff] }
 0x107   : > { %1516 = vpow2.f32 %v545_v2  ;;  %1308 = vmatprep.mubr.f32.mxu0 %v567_v6 }
 0x108   : > { %v1507_v8 = vpop.eup %1506 }
 0x109   : > { %v1509_v9 = vpop.eup %1508  ;;  %v576_v10 = vmul.f32 %v1507_v8, %v512_v4 }
 0x10a   : > { %v568_v12 = vmul.f32 %v1509_v9, %v504_v7 }
 0x10b   : > { %1321 = vmatmul.mubr.f32.gmra.mrb[4].mxu1 %v576_v10 }
 0x10c   : > { %v1511_v45 = vpop.eup %1510  ;;  %1309 = vmatmul.mubr.f32.gmra.mrb[4].mxu0 %v568_v12  ;;  %v1744_v12 = vmov (!%p1214_p0), 32  }
 0x10d   : > { %v1513_v16 = vpop.eup %1512  ;;  %v577_v0 = vmul.f32 %v1511_v45, %v513_v11  ;;  %1519 = vset.pattern.permute.xlu1 (!%p1214_p0), %v1744_v12  ;;  %1518 = vset.pattern.permute.xlu0 (!%p1214_p0), %v1744_v12 }
 0x10e   : > { %v569_v18 = vmul.f32 %v1513_v16, %v505_v14 }
 0x10f   : > { %1323 = vmatprep.mubr.f32.mxu1 %v577_v0 }
 0x110   : > { %v1515_v21 = vpop.eup %1514  ;;  %1311 = vmatprep.mubr.f32.mxu0 %v569_v18 }
 0x111   : > { %v1517_v23 = vpop.eup %1516  ;;  %v578_v25 = vmul.f32 %v1515_v21, %v514_v17 }
 0x112   : > { %v570_v53 = vmul.f32 %v1517_v23, %v506_v20 }
 0x113   : > { %1324 = vmatmul.mubr.f32.gmra.mrb[6].mxu1 %v578_v25 }
 0x114   : > { %1312 = vmatmul.mubr.f32.gmra.mrb[6].mxu0 %v570_v53 }
 0x1cc   : > { %v1304_v27 = vpop.f32.mrb[0].mxu0 }
 0x1cd   : > { %v757_v19 = vadd.f32 %v1304_v27, %v580_v24  ;;  %v677_v28 = vpop.f32.mrb[1].mxu0 }
 0x1ce   : > { %v756_v29 = vadd.f32 %v677_v28, %v579_v26 }
 0x1cf   : > { %773 = vst [vmem:[#allocation2 + $0x8] sm:$0xff] %v757_v19  ;;  %v1316_v59 = vpop.f32.mrb[0].mxu1 }
 0x1d0   : > { %772 = vst [vmem:[#allocation2] sm:$0xff] %v756_v29  ;;  %v765_v32 = vadd.f32 %v1316_v59, %v588_v30  ;;  %v717_v33 = vpop.f32.mrb[1].mxu1 }
 0x1d1   : > { %v764_v35 = vadd.f32 %v717_v33, %v587_v31 }
 0x1d2   : > { %781 = vst [vmem:[#allocation2 + $0x48] sm:$0xff] %v765_v32 }
 0x1d3   : > { %780 = vst [vmem:[#allocation2 + $0x40] sm:$0xff] %v764_v35 }
 0x1d5   : > { %v1319_v39 = vpop.f32.mrb[2].mxu1 }
 0x1d6   : > { %v1307_v60 = vpop.f32.mrb[2].mxu0  ;;  %v767_v41 = vadd.f32 %v1319_v39, %v590_v36  ;;  %v727_v42 = vpop.f32.mrb[3].mxu1  ;;  %v2070_v14 = vld [vmem:[#allocation2 + $0x8] sm:$0xff] (!%p1214_p0) }
 0x1d7   : > { %v759_v43 = vadd.f32 %v1307_v60, %v582_v37  ;;  %v687_v46 = vpop.f32.mrb[3].mxu0  ;;  %v766_v47 = vadd.f32 %v727_v42, %v589_v38  ;;  %v2063_v11 = vld [vmem:[#allocation2] sm:$0xff] (!%p1214_p0)  ;;  %vm809_vm3 = vcmp.eq.f32.partialorder (!%p1214_p0), %v2070_v14, 0.0 }
 0x1d8   : > { %783 = vst [vmem:[#allocation2 + $0x58] sm:$0xff] %v767_v41  ;;  %v758_v48 = vadd.f32 %v687_v46, %v581_v40  ;;  %vm808_vm1 = vcmp.eq.f32.partialorder (!%p1214_p0), %v2063_v11, 0.0  ;;  %v825_v18 = vsel (!%p1214_p0), %vm809_vm3, 1.0, %v2070_v14 }
 0x1d9   : > { %775 = vst [vmem:[#allocation2 + $0x18] sm:$0xff] %v759_v43  ;;  %782 = vst [vmem:[#allocation2 + $0x50] sm:$0xff] %v766_v47  ;;  %v824_v0 = vsel (!%p1214_p0), %vm808_vm1, 1.0, %v2063_v11  ;;  %v2091_v53 = vld [vmem:[#allocation2 + $0x48] sm:$0xff] (!%p1214_p0) }
 0x1da   : > { %774 = vst [vmem:[#allocation2 + $0x10] sm:$0xff] %v758_v48  ;;  %v2093_v24 = vld [vmem:[#allocation2 + $0x40] sm:$0xff] (!%p1214_p0)  ;;  %vm817_vm8 = vcmp.eq.f32.partialorder (!%p1214_p0), %v2091_v53, 0.0 }
 0x1db   : > { %vm816_vm9 = vcmp.eq.f32.partialorder (!%p1214_p0), %v2093_v24, 0.0  ;;  %v833_v31 = vsel (!%p1214_p0), %vm817_vm8, 1.0, %v2091_v53 }
 0x1dc   : > { %v832_v32 = vsel (!%p1214_p0), %vm816_vm9, 1.0, %v2093_v24 }
 0x1de   : > { %v1322_v51 = vpop.f32.mrb[4].mxu1 }
 0x1df   : > { %v1310_v44 = vpop.f32.mrb[4].mxu0  ;;  %v769_v55 = vadd.f32 %v1322_v51, %v592_v61  ;;  %v737_v56 = vpop.f32.mrb[5].mxu1  ;;  %v2099_v19 = vld [vmem:[#allocation2 + $0x58] sm:$0xff] (!%p1214_p0) }
 0x1e0   : > { %v761_v5 = vadd.f32 %v1310_v44, %v584_v49  ;;  %v697_v57 = vpop.f32.mrb[5].mxu0  ;;  %v768_v58 = vadd.f32 %v737_v56, %v591_v50  ;;  %v2065_v52 = vld [vmem:[#allocation2 + $0x18] sm:$0xff] (!%p1214_p0)  ;;  %v2101_v29 = vld [vmem:[#allocation2 + $0x50] sm:$0xff] (!%p1214_p0)  ;;  %vm819_vm10 = vcmp.eq.f32.partialorder (!%p1214_p0), %v2099_v19, 0.0 }
 0x1e1   : > { %785 = vst [vmem:[#allocation2 + $0x68] sm:$0xff] %v769_v55  ;;  %v760_v62 = vadd.f32 %v697_v57, %v583_v54  ;;  %v2061_v10 = vld [vmem:[#allocation2 + $0x10] sm:$0xff] (!%p1214_p0)  ;;  %vm811_vm2 = vcmp.eq.f32.partialorder (!%p1214_p0), %v2065_v52, 0.0  ;;  %vm818_vm11 = vcmp.eq.f32.partialorder (!%p1214_p0), %v2101_v29, 0.0  ;;  %v835_v37 = vsel (!%p1214_p0), %vm819_vm10, 1.0, %v2099_v19 }
 0x1e2   : > { %777 = vst [vmem:[#allocation2 + $0x28] sm:$0xff] %v761_v5  ;;  %784 = vst [vmem:[#allocation2 + $0x60] sm:$0xff] %v768_v58  ;;  %vm810_vm0 = vcmp.eq.f32.partialorder (!%p1214_p0), %v2061_v10, 0.0  ;;  %v827_v17 = vsel (!%p1214_p0), %vm811_vm2, 1.0, %v2065_v52  ;;  %v834_v39 = vsel (!%p1214_p0), %vm818_vm11, 1.0, %v2101_v29 }
 0x1e3   : > { %776 = vst [vmem:[#allocation2 + $0x20] sm:$0xff] %v760_v62  ;;  %v826_v16 = vsel (!%p1214_p0), %vm810_vm0, 1.0, %v2061_v10 }
 0x1e4   : > { %1520 = vrcp.f32 (!%p1214_p0), %v826_v16 }
 0x1e5   : > { %791 = sbr.rel (%p1214_p0) target bundleno = 677 (0x2a5), region = 48  ;;  %1522 = vrcp.f32 (!%p1214_p0), %v824_v0 }
 0x1e6   : > { %v1325_v2 = vpop.f32.mrb[6].mxu1  ;;  %1524 = vrcp.f32 (!%p1214_p0), %v827_v17 }
 0x1e7   : > { %v1313_v4 = vpop.f32.mrb[6].mxu0  ;;  %v771_v34 = vadd.f32 %v1325_v2, %v594_v63  ;;  %v747_v6 = vpop.f32.mrb[7].mxu1  ;;  %1526 = vrcp.f32 (!%p1214_p0), %v825_v18 }
 0x1e8   : > { %v763_v7 = vadd.f32 %v1313_v4, %v586_v1  ;;  %v707_v22 = vpop.f32.mrb[7].mxu0  ;;  %v770_v8 = vadd.f32 %v747_v6, %v593_v13  ;;  %v2107_v35 = vld [vmem:[#allocation2 + $0x68] sm:$0xff] (!%p1214_p0) }
 0x1e9   : > { %787 = vst [vmem:[#allocation2 + $0x78] sm:$0xff] %v771_v34  ;;  %v762_v9 = vadd.f32 %v707_v22, %v585_v3  ;;  %v2072_v15 = vld [vmem:[#allocation2 + $0x28] sm:$0xff] (!%p1214_p0)  ;;  %v2109_v36 = vld [vmem:[#allocation2 + $0x60] sm:$0xff] (!%p1214_p0)  ;;  %vm821_vm12 = vcmp.eq.f32.partialorder (!%p1214_p0), %v2107_v35, 0.0 }
 0x1ea   : > { %779 = vst [vmem:[#allocation2 + $0x38] sm:$0xff] %v763_v7  ;;  %786 = vst [vmem:[#allocation2 + $0x70] sm:$0xff] %v770_v8  ;;  %v2074_v45 = vld [vmem:[#allocation2 + $0x20] sm:$0xff] (!%p1214_p0)  ;;  %vm813_vm4 = vcmp.eq.f32.partialorder (!%p1214_p0), %v2072_v15, 0.0  ;;  %vm820_vm13 = vcmp.eq.f32.partialorder (!%p1214_p0), %v2109_v36, 0.0  ;;  %v837_v42 = vsel (!%p1214_p0), %vm821_vm12, 1.0, %v2107_v35 }
 0x1eb   : > { %778 = vst [vmem:[#allocation2 + $0x30] sm:$0xff] %v762_v9  ;;  %vm812_vm5 = vcmp.eq.f32.partialorder (!%p1214_p0), %v2074_v45, 0.0  ;;  %v829_v23 = vsel (!%p1214_p0), %vm813_vm4, 1.0, %v2072_v15  ;;  %v836_v46 = vsel (!%p1214_p0), %vm820_vm13, 1.0, %v2109_v36 }
 0x1ec   : > { %v828_v25 = vsel %vm812_vm5, 1.0, %v2074_v45  ;;  %1528 = vrcp.f32 %v829_v23 }
 0x1ed   : > { %1530 = vrcp.f32 %v828_v25 }
 0x1ee   : > { %v1521_v28 = vpop.eup %1520 }
 0x1ef   : > { %v1523_v30 = vpop.eup %1522  ;;  %868 = vperm.xlu1 %1519, %v1521_v28  }
 0x1f0   : > { %v1525_v59 = vpop.eup %1524  ;;  %858 = vperm.xlu0 %1518, %v1523_v30   ;;  %v2115_v60 = vld [vmem:[#allocation2 + $0x78] sm:$0xff] }
 0x1f1   : > { %v2083_v20 = vld [vmem:[#allocation2 + $0x38] sm:$0xff]  ;;  %v1527_v33 = vpop.eup %1526  ;;  %v2117_v41 = vld [vmem:[#allocation2 + $0x70] sm:$0xff]  ;;  %vm823_vm14 = vcmp.eq.f32.partialorder %v2115_v60, 0.0 }
 0x1f2   : > { %v2085_v21 = vld [vmem:[#allocation2 + $0x30] sm:$0xff]  ;;  %vm815_vm6 = vcmp.eq.f32.partialorder %v2083_v20, 0.0  ;;  %vm822_vm15 = vcmp.eq.f32.partialorder %v2117_v41, 0.0  ;;  %v839_v48 = vsel %vm823_vm14, 1.0, %v2115_v60 }
 0x1f3   : > { %vm814_vm7 = vcmp.eq.f32.partialorder %v2085_v21, 0.0  ;;  %v831_v26 = vsel %vm815_vm6, 1.0, %v2083_v20  ;;  %873 = vperm.xlu1 %1519, %v1525_v59   ;;  %v838_v49 = vsel %vm822_vm15, 1.0, %v2117_v41 }
 0x1f4   : > { %v830_v27 = vsel %vm814_vm7, 1.0, %v2085_v21  ;;  %1532 = vrcp.f32 %v831_v26  ;;  %863 = vperm.xlu0 %1518, %v1527_v33  }
 0x1f5   : > { %1534 = vrcp.f32 %v830_v27 }
 0x1f6   : > { %1536 = vrcp.f32 %v833_v31  ;;  %v1529_v38 = vpop.eup %1528 }
 0x1f7   : > { %1538 = vrcp.f32 %v832_v32  ;;  %v1531_v40 = vpop.eup %1530  ;;  %883 = vperm.xlu1 %1519, %v1529_v38  }
 0x1f8   : > { %1540 = vrcp.f32 %v835_v37  ;;  %878 = vperm.xlu0 %1518, %v1531_v40  }
 0x1f9   : > { %1542 = vrcp.f32 %v834_v39 }
 0x1fa   : > { %1544 = vrcp.f32 %v837_v42 }
 0x1fb   : > { %1546 = vrcp.f32 %v836_v46 }
 0x1fc   : > { %1548 = vrcp.f32 %v839_v48 }
 0x1fd   : > { %1550 = vrcp.f32 %v838_v49 }
 0x1fe   : > { %v1533_v43 = vpop.eup %1532 }
 0x1ff   : > { %v1535_v47 = vpop.eup %1534  ;;  %893 = vperm.xlu1 %1519, %v1533_v43  }
 0x200   : > { %v1537_v61 = vpop.eup %1536  ;;  %888 = vperm.xlu0 %1518, %v1535_v47  }
 0x201   : > { %v1539_v50 = vpop.eup %1538 }
 0x202   : > { %v1541_v51 = vpop.eup %1540 }
 0x203   : > { %903 = vperm.xlu1 %1519, %v1537_v61   ;;  %v1543_v54 = vpop.eup %1542 }
 0x204   : > { %898 = vperm.xlu0 %1518, %v1539_v50   ;;  %v1545_v44 = vpop.eup %1544 }
 0x205   : > { %v1547_v55 = vpop.eup %1546 }
 0x206   : > { %v1549_v56 = vpop.eup %1548 }
 0x207   : > { %913 = vperm.xlu1 %1519, %v1541_v51   ;;  %v1551_v5 = vpop.eup %1550 }
 0x208   : > { %908 = vperm.xlu0 %1518, %v1543_v54  }
 0x20b   : > { %923 = vperm.xlu1 %1519, %v1545_v44  }
 0x20c   : > { %918 = vperm.xlu0 %1518, %v1547_v55  }
 0x20f   : > { %933 = vperm.xlu1 %1519, %v1549_v56  }
 0x210   : > { %928 = vperm.xlu0 %1518, %v1551_v5  }
 0x26e   : > { %v869_v57 = vpop.permute.xlu1 %868 }
 0x26f   : > { %v938_v58 = vmul.f32 %v869_v57, %v2061_v10  ;;  %v859_v62 = vpop.permute.xlu0 %858 }
 0x270   : > { %v936_v63 = vmul.f32 %v859_v62, %v2063_v11 }
 0x271   : > { %v970_v1 = vmin.f32 %v938_v58, 0.0  ;;  %vm954_vm0 = vcmp.gt.f32.partialorder %v938_v58, 0.0 }
 0x272   : > { %v968_v13 = vmin.f32 %v936_v63, 0.0  ;;  %v874_v2 = vpop.permute.xlu1 %873  ;;  %vm952_vm1 = vcmp.gt.f32.partialorder %v936_v63, 0.0 }
 0x273   : > { %v988_v3 = vmul.f32 1.442695, %v970_v1  ;;  %v939_v4 = vmul.f32 %v874_v2, %v2065_v52  ;;  %v864_v34 = vpop.permute.xlu0 %863 }
 0x274   : > { %v984_v6 = vmul.f32 1.442695, %v968_v13  ;;  %v2129_v7 = vmul.f32 %v864_v34, %v2070_v14 }
 0x275   : > { %1552 = vpow2.f32 %v988_v3  ;;  %v971_v22 = vmin.f32 %v939_v4, 0.0  ;;  %vm955_vm2 = vcmp.gt.f32.partialorder %v939_v4, 0.0 }
 0x276   : > { %1554 = vpow2.f32 %v984_v6  ;;  %v969_v8 = vmin.f32 %v2129_v7, 0.0  ;;  %v884_v9 = vpop.permute.xlu1 %883  ;;  %vm953_vm3 = vcmp.gt.f32.partialorder %v2129_v7, 0.0 }
 0x277   : > { %v990_v10 = vmul.f32 1.442695, %v971_v22  ;;  %v2133_v11 = vmul.f32 %v884_v9, %v2072_v15  ;;  %v879_v12 = vpop.permute.xlu0 %878 }
 0x278   : > { %v986_v16 = vmul.f32 1.442695, %v969_v8  ;;  %v2136_v0 = vmul.f32 %v879_v12, %v2074_v45 }
 0x279   : > { %1556 = vpow2.f32 %v990_v10  ;;  %v973_v52 = vmin.f32 %v2133_v11, 0.0  ;;  %vm957_vm4 = vcmp.gt.f32.partialorder %v2133_v11, 0.0 }
 0x27a   : > { %1558 = vpow2.f32 %v986_v16  ;;  %v972_v14 = vmin.f32 %v2136_v0, 0.0  ;;  %vm956_vm5 = vcmp.gt.f32.partialorder %v2136_v0, 0.0 }
 0x27b   : > { %v994_v18 = vmul.f32 1.442695, %v973_v52 }
 0x27c   : > { %v992_v26 = vmul.f32 1.442695, %v972_v14 }
 0x27d   : > { %1560 = vpow2.f32 %v994_v18 }
 0x27e   : > { %v894_v17 = vpop.permute.xlu1 %893  ;;  %1562 = vpow2.f32 %v992_v26 }
 0x27f   : > { %v2141_v23 = vmul.f32 %v894_v17, %v2083_v20  ;;  %v889_v25 = vpop.permute.xlu0 %888  ;;  %v1553_v30 = vpop.eup %1552 }
 0x280   : > { %v2144_v15 = vmul.f32 %v889_v25, %v2085_v21  ;;  %v1555_v32 = vpop.eup %1554  ;;  %v1217_v33 = vadd.f32 -1.0, %v1553_v30 }
 0x281   : > { %v975_v45 = vmin.f32 %v2141_v23, 0.0  ;;  %v1215_v38 = vadd.f32 -1.0, %v1555_v32  ;;  %vm959_vm6 = vcmp.gt.f32.partialorder %v2141_v23, 0.0 }
 0x282   : > { %v974_v27 = vmin.f32 %v2144_v15, 0.0  ;;  %v904_v28 = vpop.permute.xlu1 %903  ;;  %v1034_v40 = vsel %vm954_vm0, %v938_v58, %v1217_v33  ;;  %vm958_vm7 = vcmp.gt.f32.partialorder %v2144_v15, 0.0 }
 0x283   : > { %v998_v31 = vmul.f32 1.442695, %v975_v45  ;;  %v2149_v59 = vmul.f32 %v904_v28, %v2091_v53  ;;  %v899_v20 = vpop.permute.xlu0 %898  ;;  %v1557_v43 = vpop.eup %1556  ;;  %1050 = vst [vmem:[%s1948_s30 + $0x10] sm:$0xff] %v1034_v40  ;;  %v1032_v46 = vsel %vm952_vm1, %v936_v63, %v1215_v38 }
 0x284   : > { %v996_v37 = vmul.f32 1.442695, %v974_v27  ;;  %v2152_v21 = vmul.f32 %v899_v20, %v2093_v24  ;;  %v1559_v61 = vpop.eup %1558  ;;  %1048 = vst [vmem:[%s1948_s30] sm:$0xff] %v1032_v46  ;;  %v1218_v49 = vadd.f32 -1.0, %v1557_v43 }
 0x285   : > { %1564 = vpow2.f32 %v998_v31  ;;  %v977_v39 = vmin.f32 %v2149_v59, 0.0  ;;  %v1216_v54 = vadd.f32 -1.0, %v1559_v61  ;;  %vm961_vm8 = vcmp.gt.f32.partialorder %v2149_v59, 0.0 }
 0x286   : > { %1566 = vpow2.f32 %v996_v37  ;;  %v976_v53 = vmin.f32 %v2152_v21, 0.0  ;;  %v914_v42 = vpop.permute.xlu1 %913  ;;  %v1035_v55 = vsel %vm955_vm2, %v939_v4, %v1218_v49  ;;  %vm960_vm9 = vcmp.gt.f32.partialorder %v2152_v21, 0.0 }
 0x287   : > { %v1002_v47 = vmul.f32 1.442695, %v977_v39  ;;  %v2158_v48 = vmul.f32 %v914_v42, %v2099_v19  ;;  %v909_v24 = vpop.permute.xlu0 %908  ;;  %v1561_v5 = vpop.eup %1560  ;;  %1051 = vst [vmem:[%s1948_s30 + $0x18] sm:$0xff] %v1035_v55  ;;  %v1033_v57 = vsel %vm953_vm3, %v2129_v7, %v1216_v54 }
 0x288   : > { %v1000_v50 = vmul.f32 1.442695, %v976_v53  ;;  %v2162_v51 = vmul.f32 %v909_v24, %v2101_v29  ;;  %v1563_v63 = vpop.eup %1562  ;;  %1049 = vst [vmem:[%s1948_s30 + $0x8] sm:$0xff] %v1033_v57  ;;  %v1220_v1 = vadd.f32 -1.0, %v1561_v5 }
 0x289   : > { %1568 = vpow2.f32 %v1002_v47  ;;  %v979_v44 = vmin.f32 %v2158_v48, 0.0  ;;  %v1219_v3 = vadd.f32 -1.0, %v1563_v63  ;;  %vm963_vm10 = vcmp.gt.f32.partialorder %v2158_v48, 0.0 }
 0x28a   : > { %1570 = vpow2.f32 %v1000_v50  ;;  %v978_v19 = vmin.f32 %v2162_v51, 0.0  ;;  %v924_v56 = vpop.permute.xlu1 %923  ;;  %v1037_v34 = vsel %vm957_vm4, %v2133_v11, %v1220_v1  ;;  %vm962_vm11 = vcmp.gt.f32.partialorder %v2162_v51, 0.0 }
 0x28b   : > { %v1006_v58 = vmul.f32 1.442695, %v979_v44  ;;  %v2170_v29 = vmul.f32 %v924_v56, %v2107_v35  ;;  %v919_v62 = vpop.permute.xlu0 %918  ;;  %1053 = vst [vmem:[%s1948_s30 + $0x28] sm:$0xff] %v1037_v34 }
 0x28c   : > { %v1004_v13 = vmul.f32 1.442695, %v978_v19  ;;  %v2174_v2 = vmul.f32 %v919_v62, %v2109_v36  ;;  %v1036_v36 = vsel %vm956_vm5, %v2136_v0, %v1219_v3 }
 0x28d   : > { %1572 = vpow2.f32 %v1006_v58  ;;  %v981_v4 = vmin.f32 %v2170_v29, 0.0  ;;  %1052 = vst [vmem:[%s1948_s30 + $0x20] sm:$0xff] %v1036_v36  ;;  %vm965_vm12 = vcmp.gt.f32.partialorder %v2170_v29, 0.0 }
 0x28e   : > { %1574 = vpow2.f32 %v1004_v13  ;;  %v980_v35 = vmin.f32 %v2174_v2, 0.0  ;;  %v934_v6 = vpop.permute.xlu1 %933  ;;  %vm964_vm13 = vcmp.gt.f32.partialorder %v2174_v2, 0.0 }
 0x28f   : > { %v1565_v7 = vpop.eup %1564  ;;  %v1010_v22 = vmul.f32 1.442695, %v981_v4  ;;  %v951_v8 = vmul.f32 %v934_v6, %v2115_v60  ;;  %v929_v9 = vpop.permute.xlu0 %928 }
 0x290   : > { %v1567_v10 = vpop.eup %1566  ;;  %v1222_v12 = vadd.f32 -1.0, %v1565_v7  ;;  %v1008_v11 = vmul.f32 1.442695, %v980_v35  ;;  %v950_v16 = vmul.f32 %v929_v9, %v2117_v41 }
 0x291   : > { %v1221_v52 = vadd.f32 -1.0, %v1567_v10  ;;  %1576 = vpow2.f32 %v1010_v22  ;;  %v983_v14 = vmin.f32 %v951_v8, 0.0  ;;  %vm967_vm14 = vcmp.gt.f32.partialorder %v951_v8, 0.0 }
 0x292   : > { %v1039_v17 = vsel %vm959_vm6, %v2141_v23, %v1222_v12  ;;  %1578 = vpow2.f32 %v1008_v11  ;;  %v982_v60 = vmin.f32 %v950_v16, 0.0  ;;  %vm966_vm15 = vcmp.gt.f32.partialorder %v950_v16, 0.0 }
 0x293   : > { %v1569_v0 = vpop.eup %1568  ;;  %1055 = vst [vmem:[%s1948_s30 + $0x38] sm:$0xff] %v1039_v17  ;;  %v1038_v18 = vsel %vm958_vm7, %v2144_v15, %v1221_v52  ;;  %v1014_v25 = vmul.f32 1.442695, %v983_v14 }
 0x294   : > { %v1571_v26 = vpop.eup %1570  ;;  %1054 = vst [vmem:[%s1948_s30 + $0x30] sm:$0xff] %v1038_v18  ;;  %v1224_v41 = vadd.f32 -1.0, %v1569_v0  ;;  %v1012_v45 = vmul.f32 1.442695, %v982_v60 }
 0x295   : > { %v1223_v27 = vadd.f32 -1.0, %v1571_v26  ;;  %1580 = vpow2.f32 %v1014_v25 }
 0x296   : > { %v1041_v23 = vsel %vm961_vm8, %v2149_v59, %v1224_v41  ;;  %1582 = vpow2.f32 %v1012_v45 }
 0x297   : > { %v1573_v28 = vpop.eup %1572  ;;  %1057 = vst [vmem:[%s1948_s30 + $0x48] sm:$0xff] %v1041_v23  ;;  %v1040_v15 = vsel %vm960_vm9, %v2152_v21, %v1223_v27 }
 0x298   : > { %v1575_v30 = vpop.eup %1574  ;;  %1056 = vst [vmem:[%s1948_s30 + $0x40] sm:$0xff] %v1040_v15  ;;  %v1226_v31 = vadd.f32 -1.0, %v1573_v28 }
 0x299   : > { %v1225_v20 = vadd.f32 -1.0, %v1575_v30 }
 0x29a   : > { %v1043_v32 = vsel %vm963_vm10, %v2158_v48, %v1226_v31 }
 0x29b   : > { %v1577_v59 = vpop.eup %1576  ;;  %1059 = vst [vmem:[%s1948_s30 + $0x58] sm:$0xff] %v1043_v32  ;;  %v1042_v33 = vsel %vm962_vm11, %v2162_v51, %v1225_v20 }
 0x29c   : > { %v1579_v37 = vpop.eup %1578  ;;  %1058 = vst [vmem:[%s1948_s30 + $0x50] sm:$0xff] %v1042_v33  ;;  %v1228_v21 = vadd.f32 -1.0, %v1577_v59 }
 0x29d   : > { %v1227_v38 = vadd.f32 -1.0, %v1579_v37 }
 0x29e   : > { %v1045_v39 = vsel %vm965_vm12, %v2170_v29, %v1228_v21 }
 0x29f   : > { %v1581_v40 = vpop.eup %1580  ;;  %1061 = vst [vmem:[%s1948_s30 + $0x68] sm:$0xff] %v1045_v39  ;;  %v1044_v53 = vsel %vm964_vm13, %v2174_v2, %v1227_v38 }
 0x2a0   : > { %v1583_v42 = vpop.eup %1582  ;;  %1060 = vst [vmem:[%s1948_s30 + $0x60] sm:$0xff] %v1044_v53  ;;  %v1230_v43 = vadd.f32 -1.0, %v1581_v40 }
 0x2a1   : > { %v1229_v46 = vadd.f32 -1.0, %v1583_v42 }
 0x2a2   : > { %v1047_v47 = vsel %vm967_vm14, %v951_v8, %v1230_v43 }
 0x2a3   : > { %1063 = vst [vmem:[%s1948_s30 + $0x78] sm:$0xff] %v1047_v47  ;;  %v1046_v48 = vsel %vm966_vm15, %v950_v16, %v1229_v46 }
 0x2a4   : > { %1062 = vst [vmem:[%s1948_s30 + $0x70] sm:$0xff] %v1046_v48 }
 0x2a5 PF: > { %s1237_s21 = sshll.u32 %s1724_s22, 11  ;;  %s1078_s27 = sshll.u32 %s1948_s30, 4  ;;  %s2219_s27 = int_to_ptr.vmem [resolvable:$true] %s1078_s27 }
 0x2a6   : > { %s2216_s29 = scalar_lea.hbm %s2288_s4, %s1237_s21  ;;  %s2307_s26 = sand.u32 1, %s1700_s16  }
 0x2a7   : > { %s2223_s6 = scalar_lea.sflag [#allocation5], %s2307_s26  ;;  %s1614_s5 = scalar_lea.vmem %s2219_s27, 2048 }
 0x2a8   : > { %p1615_p1 = scmp.ne.s32.totalorder %s2219_s27, %s1614_s5  ;;  %p2308_p5 = scmp.ne.s32.totalorder %s2302_s11, 0 }
 0x2a9   : > { %s1745_s22 = smov [#allocation6]  }
 0x2aa   : > { %p1616_p8 = pnand %p1615_p1, %p2308_p5  ;;  %s1618_s12 = sshll.u32 %s1745_s22, 4  ;;  %s1619_s12 = int_to_ptr.vmem [resolvable:$false] %s1618_s12 }
 0x2ab   : > { %s1620_s8 = scalar_lea.vmem %s1619_s12, 4096  ;;  %p1621_p10 = scmp.lt.s32.totalorder %s2219_s27, %s1619_s12 }
 0x2ac   : > { %p1617_p3 = pneg %p1616_p8  ;;  %p1622_p11 = scmp.lt.s32.totalorder %s1620_s8, %s1614_s5 }
 0x2ae   : > { %p1623_p6 = por %p1622_p11, %p1621_p10 }
 0x2b0   : > { %p1624_p9 = pnand %p1623_p6, %p1617_p3 }
 0x2b2   : > { %1627 = shalt.err (!%p1624_p9)
}
 0x2b3   : > { %s1628_s9 = scalar_lea.hbm %s2216_s29, 2048  ;;  %s1632_s7 = scalar_lea.hbm %s2288_s4, 4096 }
 0x2b4   : > { %p1629_p13 = scmp.ne.s32.totalorder %s2216_s29, %s1628_s9  ;;  %p1633_p4 = scmp.lt.u32.totalorder %s2216_s29, %s2288_s4 }
 0x2b5   : > { %p1634_p7 = scmp.lt.u32.totalorder %s1632_s7, %s1628_s9  ;;  %p1636_p1 = scmp.lt.u32.totalorder %s1628_s9, %s2216_s29 }
 0x2b6   : > { %p1630_p12 = pnand %p1629_p13, %p2308_p5 }
 0x2b7   : > { %p1635_p0 = por %p1634_p7, %p1633_p4 }
 0x2b8   : > { %p1631_p2 = pneg %p1630_p12 }
 0x2b9   : > { %p1637_p8 = por %p1636_p1, %p1635_p0 }
 0x2bb   : > { %p1638_p3 = pnand %p1637_p8, %p1631_p2 }
 0x2bd   : > { %1641 = shalt.err (!%p1638_p3)
}
 0x2be   : > { %s1746_s24 = smov 128   ;;  %s1747_s21 = smov 8  }
 0x2bf   : > { %1376 = dma.vmem_to_hbm [thread:$0]  (%p2308_p5), %s2219_s27, 2048, %s2216_s29, %s2223_s6, %s1746_s24, %s1746_s24, %s1747_s21  }
 0x2c0 PF: > { %p1387_p10 = scmp.ge.s32.totalorder %s1736_s25, 2  ;;  %s1093_s23 = sand.u32 1, %s1696_s15  }
 0x2c1   : > { %p2309_p11 = scmp.ne.s32.totalorder %s2304_s14, 0  ;;  %s1094_s28 = scalar_lea.sflag [#allocation5], %s1093_s23 }
 0x2c3   : > { %p1383_p6 = pnand %p1387_p10, %p2309_p11 }
 0x2c5   : > { %1691 = dma.done.wait (!%p1383_p6), %s1094_s28, 2048  }
 0x2c6   : > { %1693 = vsyncadd (!%p1383_p6), %s1094_s28, 4294965248  ;;  %s20_s25 = sadd.s32 1, %s1736_s25   ;;  %s2310_s26 = sld [smem:[#allocation13_spill]] }
 0x2c7   : > { %p17_p9 = scmp.ge.s32.totalorder %s20_s25, 6   ;;  %s2311_s21 = sld [smem:[#allocation9_spill]] }
 0x2c8   : > { %s2312_s22 = sld [smem:[#allocation10_spill]]  ;;  %s2313_s23 = sld [smem:[#allocation11_spill]] }
 0x2c9   : > { %s2314_s24 = sld [smem:[#allocation12_spill]]  ;;  %s2315_s15 = smov %s1700_s16 }
 0x2ca   : > { %s2316_s16 = smov %s1704_s17  ;;  %s2318_s18 = smov %s1712_s19 }
 0x2cb   : > { %s2319_s19 = smov %s1716_s20  ;;  %s2320_s20 = smov %s1863_s13 }
 0x2cc   : > { %s2317_s17 = smov %s2310_s26  ;;  %19 = sbr.rel (!%p17_p9) target bundleno = 11 (0xb), region = 98 }
 0x2d3   :  { %1099 = vsyncpa [#allocation4], 1 }
 0x2d4   :  { %1101 = vsyncpa [#allocation4 + $0x1], 1 }
 0x2d5   :  { %1102 = vsyncpa [#allocation5], 1 }
 0x2d6   :  { %1104 = vsyncpa [#allocation5 + $0x1], 1 }

</bundles_post_ra>
